<compile_context>
chip_gen: v6e
topology: v6e:2x2x1
jax: 0.10.0
libtpu: 0.0.40
codegen_flags: <defaults>
</compile_context>

<pallas_src>
import functools

import jax
import jax.numpy as jnp
from jax.experimental import pallas as pl
from jax.experimental.pallas import tpu as pltpu


def _round_up(x, m):
    return ((x + m - 1) // m) * m


def _cdiv(a, b):
    return -(-a // b)


# ---------------------------------------------------------------------------
# Kernel
# ---------------------------------------------------------------------------
def _prediction_kernel(
    state_ref,             # [TB, hidden_dim]           f32
    w1_ref, b1_ref,        # [hidden_dim, 256] bf16, [1, 256] f32
    wh_ref, bh_ref,        # fused head layer 1: [256, 256] bf16, [1, 256] f32
    w2_ref, b2_ref,        # fused block-diag layer 2: [256, OUT_PAD] bf16, [1, OUT_PAD] f32
    out_ref,               # [TB, OUT_PAD] f32  (policy | value | zero pad)
    *, action_dim, out_pad,
):
    compute_dtype = w1_ref.dtype  # bf16

    # Shared trunk: Linear(hidden_dim -> 256) + ReLU   (bf16 operands, f32 acc)
    x = state_ref[...].astype(compute_dtype)
    h = jnp.dot(x, w1_ref[...], preferred_element_type=jnp.float32) + b1_ref[...]
    h = jnp.maximum(h, 0.0)

    # Fused head layer 1: [TB,256] @ [256,256] -> [policy_hidden(128) | value_hidden(128)]
    hp = jnp.dot(h.astype(compute_dtype), wh_ref[...],
                 preferred_element_type=jnp.float32) + bh_ref[...]
    hp = jnp.maximum(hp, 0.0)

    # Fused head layer 2 (block-diagonal): one matmul yields policy logits and value.
    out = jnp.dot(hp.astype(compute_dtype), w2_ref[...],
                  preferred_element_type=jnp.float32) + b2_ref[...]

    # tanh only on the 128-lane slab that contains the value column; the value
    # column itself is selected with a lane-index compare (VPU select).
    slab = (action_dim // 128) * 128
    vslab = out[:, slab:slab + 128]
    col = jax.lax.broadcasted_iota(jnp.int32, vslab.shape, 1) + slab
    vslab = jnp.where(col == action_dim, jnp.tanh(vslab), vslab)
    if out_pad > 128:
        pieces = []
        if slab > 0:
            pieces.append(out[:, :slab])
        pieces.append(vslab)
        if slab + 128 < out_pad:
            pieces.append(out[:, slab + 128:])
        out = jnp.concatenate(pieces, axis=1)
    else:
        out = vslab

    out_ref[...] = out.astype(out_ref.dtype)


# ---------------------------------------------------------------------------
# One-time parameter fusion (keep OUT of the per-call hot path)
# ---------------------------------------------------------------------------
def prepare_params(params, *, compute_dtype=jnp.bfloat16):
    """Fuse head weights once; returns bf16 weights + f32 biases."""
    action_dim = params["wp2"].shape[1]
    out_pad = _round_up(action_dim + 1, 128)

    # Head layer 1 fusion: [wp1 | wv1] -> [256, 256]
    w_heads = jnp.concatenate([params["wp1"], params["wv1"]], axis=1)
    b_heads = jnp.concatenate([params["bp1"], params["bv1"]], axis=1)

    # Head layer 2 fusion: block-diagonal [256, out_pad], zero-padded columns.
    w2 = jnp.zeros((256, out_pad), jnp.float32)
    w2 = w2.at[:128, :action_dim].set(params["wp2"])
    w2 = w2.at[128:, action_dim:action_dim + 1].set(params["wv2"])
    b2 = jnp.zeros((1, out_pad), jnp.float32)
    b2 = b2.at[:, :action_dim].set(params["bp2"])
    b2 = b2.at[:, action_dim:action_dim + 1].set(params["bv2"])

    return dict(
        w1=params["w1"].astype(compute_dtype),
        b1=params["b1"].astype(jnp.float32),
        w_heads=w_heads.astype(compute_dtype),
        b_heads=b_heads.astype(jnp.float32),
        w2=w2.astype(compute_dtype),
        b2=b2.astype(jnp.float32),
    )


# ---------------------------------------------------------------------------
# Batch tiling: big tiles, >=2 (even) grid steps for v7x megacore sharding
# ---------------------------------------------------------------------------
def _choose_batch_tiling(B, max_tile=2048):
    n_tiles = max(2, _cdiv(B, max_tile))
    if n_tiles % 2:
        n_tiles += 1
    tb = _round_up(_cdiv(B, n_tiles), 8)
    b_pad = n_tiles * tb
    return tb, b_pad, n_tiles


# ---------------------------------------------------------------------------
# Forward wrapper
# ---------------------------------------------------------------------------
def prediction_network(state, fused, action_dim):
    """state: [B, hidden_dim] f32 -> (policy_logits [B, action_dim], value [B, 1])"""
    B, hidden_dim = state.shape
    out_pad = fused["w2"].shape[1]

    tb, b_pad, n_tiles = _choose_batch_tiling(B)
    if b_pad != B:
        state = jnp.pad(state, ((0, b_pad - B), (0, 0)))

    grid = (n_tiles,)

    # Weights/biases: same block every grid step -> stay resident in VMEM.
    def _resident(shape):
        return pl.BlockSpec(shape, lambda i: (0, 0))

    flops = 2 * b_pad * (hidden_dim * 256 + 256 * 256 + 256 * out_pad)
    transcendentals = b_pad * 128          # tanh over one 128-lane slab per row
    bytes_accessed = (
        4 * b_pad * hidden_dim                           # state in (f32)
        + 2 * (hidden_dim * 256 + 256 * 256 + 256 * out_pad)  # bf16 weights
        + 4 * (256 + 256 + out_pad)                      # f32 biases
        + 4 * b_pad * out_pad                            # combined output (f32)
    )

    combined = pl.pallas_call(
        functools.partial(_prediction_kernel, action_dim=action_dim, out_pad=out_pad),
        out_shape=jax.ShapeDtypeStruct((b_pad, out_pad), jnp.float32),
        grid=grid,
        in_specs=[
            pl.BlockSpec((tb, hidden_dim), lambda i: (i, 0)),    # state (batch-tiled)
            _resident((hidden_dim, 256)), _resident((1, 256)),   # w1, b1
            _resident((256, 256)), _resident((1, 256)),          # fused head layer 1
            _resident((256, out_pad)), _resident((1, out_pad)),  # fused head layer 2
        ],
        out_specs=pl.BlockSpec((tb, out_pad), lambda i: (i, 0)),
        compiler_params=pltpu.CompilerParams(
            dimension_semantics=("parallel",),
            vmem_limit_bytes=32 * 1024 * 1024,
        ),
        cost_estimate=pl.CostEstimate(
            flops=flops,
            transcendentals=transcendentals,
            bytes_accessed=bytes_accessed,
        ),
    )(state, fused["w1"], fused["b1"], fused["w_heads"], fused["b_heads"],
      fused["w2"], fused["b2"])

    policy = combined[:B, :action_dim]
    value = combined[:B, action_dim:action_dim + 1]
    return policy, value


# ---------------------------------------------------------------------------
# Init + pure-JAX reference
# ---------------------------------------------------------------------------
def init_params(key, hidden_dim, action_dim):
    """Deterministic init mirroring nn.Linear's U(-1/sqrt(fan_in), 1/sqrt(fan_in))."""
    def linear(key, fan_in, fan_out):
        kw, kb = jax.random.split(key)
        bound = 1.0 / jnp.sqrt(fan_in)
        w = jax.random.uniform(kw, (fan_in, fan_out), jnp.float32, -bound, bound)
        b = jax.random.uniform(kb, (1, fan_out), jnp.float32, -bound, bound)
        return w, b

    k1, k2, k3, k4, k5 = jax.random.split(key, 5)
    w1, b1 = linear(k1, hidden_dim, 256)
    wp1, bp1 = linear(k2, 256, 128)
    wp2, bp2 = linear(k3, 128, action_dim)
    wv1, bv1 = linear(k4, 256, 128)
    wv2, bv2 = linear(k5, 128, 1)
    return dict(w1=w1, b1=b1, wp1=wp1, bp1=bp1, wp2=wp2, bp2=bp2,
                wv1=wv1, bv1=bv1, wv2=wv2, bv2=bv2)


def prediction_network_ref(state, p):
    """Pure-JAX f32 reference for correctness check."""
    h = jax.nn.relu(state @ p["w1"] + p["b1"])
    pol = jax.nn.relu(h @ p["wp1"] + p["bp1"]) @ p["wp2"] + p["bp2"]
    val = jnp.tanh(jax.nn.relu(h @ p["wv1"] + p["bv1"]) @ p["wv2"] + p["bv2"])
    return pol, val


if __name__ == "__main__":
    hidden_dim = 32
    action_dim = 8
    batch = 8

    key = jax.random.PRNGKey(0)
    k_state, k_params = jax.random.split(key)
    state = jax.random.normal(k_state, (batch, hidden_dim), jnp.float32)
    params = init_params(k_params, hidden_dim, action_dim)

    # One-time weight fusion (would be cached in a real inference loop).
    fused = prepare_params(params)

    policy, value = jax.block_until_ready(
        prediction_network(state, fused, action_dim))

    pol_ref, val_ref = prediction_network_ref(state, params)
    assert policy.shape == (batch, action_dim)
    assert value.shape == (batch, 1)
    # bf16 matmul operands -> compare to the f32 reference with bf16-level tolerance.
    assert jnp.allclose(policy, pol_ref, atol=2e-2, rtol=2e-2)
    assert jnp.allclose(value, val_ref, atol=2e-2, rtol=2e-2)

    print("KERNEL_OK")
</pallas_src>

<mosaic_0001>
module attributes {stable_mosaic.version = 11 : i64} {
  func.func @_prediction_kernel(%arg0: i32, %arg1: memref<8x32xf32, #tpu.memory_space<vmem>>, %arg2: memref<32x256xbf16, #tpu.memory_space<vmem>>, %arg3: memref<1x256xf32, #tpu.memory_space<vmem>>, %arg4: memref<256x256xbf16, #tpu.memory_space<vmem>>, %arg5: memref<1x256xf32, #tpu.memory_space<vmem>>, %arg6: memref<256x128xbf16, #tpu.memory_space<vmem>>, %arg7: memref<1x128xf32, #tpu.memory_space<vmem>>, %arg8: memref<8x128xf32, #tpu.memory_space<vmem>>) attributes {dimension_semantics = [#tpu.dimension_semantics<parallel>], iteration_bounds = array<i64: 2>, scalar_prefetch = 0 : i64, scratch_operands = 0 : i64, tpu.core_type = #tpu.core_type<tc>, window_params = [{transform_indices = @transform_0, window_bounds = array<i64: 8, 32>}, {pipeline_mode = #tpu.pipeline_mode<synchronous>, transform_indices = @transform_1, window_bounds = array<i64: 32, 256>}, {pipeline_mode = #tpu.pipeline_mode<synchronous>, transform_indices = @transform_2, window_bounds = array<i64: 1, 256>}, {pipeline_mode = #tpu.pipeline_mode<synchronous>, transform_indices = @transform_3, window_bounds = array<i64: 256, 256>}, {pipeline_mode = #tpu.pipeline_mode<synchronous>, transform_indices = @transform_4, window_bounds = array<i64: 1, 256>}, {pipeline_mode = #tpu.pipeline_mode<synchronous>, transform_indices = @transform_5, window_bounds = array<i64: 256, 128>}, {pipeline_mode = #tpu.pipeline_mode<synchronous>, transform_indices = @transform_6, window_bounds = array<i64: 1, 128>}, {transform_indices = @transform_7, window_bounds = array<i64: 8, 128>}]} {
    %c0 = arith.constant 0 : index
    %c0_0 = arith.constant 0 : index
    %0 = vector.load %arg1[%c0, %c0_0] : memref<8x32xf32, #tpu.memory_space<vmem>>, vector<8x32xf32>
    %1 = arith.truncf %0 : vector<8x32xf32> to vector<8x32xbf16>
    %c0_1 = arith.constant 0 : index
    %c0_2 = arith.constant 0 : index
    %2 = vector.load %arg2[%c0_1, %c0_2] : memref<32x256xbf16, #tpu.memory_space<vmem>>, vector<32x256xbf16>
    %cst = arith.constant dense<0.000000e+00> : vector<8x256xf32>
    %3 = tpu.matmul %1, %2, %cst {dimension_numbers = #tpu.dot_dimension_numbers<[1], [0], [0], [1], [0, 0, 1, 1], [], []>} : vector<8x32xbf16>, vector<32x256xbf16>, vector<8x256xf32> -> vector<8x256xf32>
    %c0_3 = arith.constant 0 : index
    %c0_4 = arith.constant 0 : index
    %4 = vector.load %arg3[%c0_3, %c0_4] : memref<1x256xf32, #tpu.memory_space<vmem>>, vector<1x256xf32>
    %5 = vector.broadcast %4 : vector<1x256xf32> to vector<8x256xf32>
    %6 = arith.addf %3, %5 : vector<8x256xf32>
    %cst_5 = arith.constant 0.000000e+00 : f32
    %7 = vector.broadcast %cst_5 : f32 to vector<8x256xf32>
    %8 = arith.maximumf %6, %7 : vector<8x256xf32>
    %9 = arith.truncf %8 : vector<8x256xf32> to vector<8x256xbf16>
    %c0_6 = arith.constant 0 : index
    %c0_7 = arith.constant 0 : index
    %10 = vector.load %arg4[%c0_6, %c0_7] : memref<256x256xbf16, #tpu.memory_space<vmem>>, vector<256x256xbf16>
    %cst_8 = arith.constant dense<0.000000e+00> : vector<8x256xf32>
    %11 = tpu.matmul %9, %10, %cst_8 {dimension_numbers = #tpu.dot_dimension_numbers<[1], [0], [0], [1], [0, 0, 1, 1], [], []>} : vector<8x256xbf16>, vector<256x256xbf16>, vector<8x256xf32> -> vector<8x256xf32>
    %c0_9 = arith.constant 0 : index
    %c0_10 = arith.constant 0 : index
    %12 = vector.load %arg5[%c0_9, %c0_10] : memref<1x256xf32, #tpu.memory_space<vmem>>, vector<1x256xf32>
    %13 = vector.broadcast %12 : vector<1x256xf32> to vector<8x256xf32>
    %14 = arith.addf %11, %13 : vector<8x256xf32>
    %cst_11 = arith.constant 0.000000e+00 : f32
    %15 = vector.broadcast %cst_11 : f32 to vector<8x256xf32>
    %16 = arith.maximumf %14, %15 : vector<8x256xf32>
    %17 = arith.truncf %16 : vector<8x256xf32> to vector<8x256xbf16>
    %c0_12 = arith.constant 0 : index
    %c0_13 = arith.constant 0 : index
    %18 = vector.load %arg6[%c0_12, %c0_13] : memref<256x128xbf16, #tpu.memory_space<vmem>>, vector<256x128xbf16>
    %cst_14 = arith.constant dense<0.000000e+00> : vector<8x128xf32>
    %19 = tpu.matmul %17, %18, %cst_14 {dimension_numbers = #tpu.dot_dimension_numbers<[1], [0], [0], [1], [0, 0, 1, 1], [], []>} : vector<8x256xbf16>, vector<256x128xbf16>, vector<8x128xf32> -> vector<8x128xf32>
    %c0_15 = arith.constant 0 : index
    %c0_16 = arith.constant 0 : index
    %20 = vector.load %arg7[%c0_15, %c0_16] : memref<1x128xf32, #tpu.memory_space<vmem>>, vector<1x128xf32>
    %21 = vector.broadcast %20 : vector<1x128xf32> to vector<8x128xf32>
    %22 = arith.addf %19, %21 : vector<8x128xf32>
    %23 = tpu.iota {dimensions = array<i32: 1>} : vector<8x128xi32>
    %c0_i32 = arith.constant 0 : i32
    %24 = vector.broadcast %c0_i32 : i32 to vector<8x128xi32>
    %25 = arith.addi %23, %24 : vector<8x128xi32>
    %c8_i32 = arith.constant 8 : i32
    %26 = vector.broadcast %c8_i32 : i32 to vector<8x128xi32>
    %27 = arith.cmpi eq, %25, %26 : vector<8x128xi32>
    %28 = math.tanh %22 : vector<8x128xf32>
    %29 = arith.select %27, %28, %22 : vector<8x128xi1>, vector<8x128xf32>
    %c0_17 = arith.constant 0 : index
    %c0_18 = arith.constant 0 : index
    %30 = vector.load %arg8[%c0_17, %c0_18] : memref<8x128xf32, #tpu.memory_space<vmem>>, vector<8x128xf32>
    tpu.vector_store %arg8[%c0_17, %c0_18], %29 {strides = array<i32>} : memref<8x128xf32, #tpu.memory_space<vmem>>, vector<8x128xf32>,
    return
  }
  func.func @transform_0(%arg0: i32) -> (i32, i32) {
    %c0_i32 = arith.constant 0 : i32
    %c0_i32_0 = arith.constant 0 : i32
    return %arg0, %c0_i32 : i32, i32
  }
  func.func @transform_1(%arg0: i32) -> (i32, i32) {
    %c0_i32 = arith.constant 0 : i32
    %c0_i32_0 = arith.constant 0 : i32
    %c0_i32_1 = arith.constant 0 : i32
    return %c0_i32, %c0_i32_0 : i32, i32
  }
  func.func @transform_2(%arg0: i32) -> (i32, i32) {
    %c0_i32 = arith.constant 0 : i32
    %c0_i32_0 = arith.constant 0 : i32
    %c0_i32_1 = arith.constant 0 : i32
    return %c0_i32, %c0_i32_0 : i32, i32
  }
  func.func @transform_3(%arg0: i32) -> (i32, i32) {
    %c0_i32 = arith.constant 0 : i32
    %c0_i32_0 = arith.constant 0 : i32
    %c0_i32_1 = arith.constant 0 : i32
    return %c0_i32, %c0_i32_0 : i32, i32
  }
  func.func @transform_4(%arg0: i32) -> (i32, i32) {
    %c0_i32 = arith.constant 0 : i32
    %c0_i32_0 = arith.constant 0 : i32
    %c0_i32_1 = arith.constant 0 : i32
    return %c0_i32, %c0_i32_0 : i32, i32
  }
  func.func @transform_5(%arg0: i32) -> (i32, i32) {
    %c0_i32 = arith.constant 0 : i32
    %c0_i32_0 = arith.constant 0 : i32
    %c0_i32_1 = arith.constant 0 : i32
    return %c0_i32, %c0_i32_0 : i32, i32
  }
  func.func @transform_6(%arg0: i32) -> (i32, i32) {
    %c0_i32 = arith.constant 0 : i32
    %c0_i32_0 = arith.constant 0 : i32
    %c0_i32_1 = arith.constant 0 : i32
    return %c0_i32, %c0_i32_0 : i32, i32
  }
  func.func @transform_7(%arg0: i32) -> (i32, i32) {
    %c0_i32 = arith.constant 0 : i32
    %c0_i32_0 = arith.constant 0 : i32
    return %arg0, %c0_i32 : i32, i32
  }
}

</mosaic_0001>

<bundles_post_ra>
// kernel: tpu_custom_call.1
= control target key start
LH: loop header
LB: loop body
LE: loop exit
PB: predicated region body
PF: predicated region fallthrough
CT: control target
= control target key end

     0   :  { %s1643_s0 = inlined_call_operand.hbm [shape: f32[16,32], index: 0, kind: input, shape index: {}]   ;;  %s1644_s1 = inlined_call_operand.hbm [shape: bf16[32,256], index: 1, kind: input, shape index: {}]   ;;  %s1645_s2 = inlined_call_operand.vmem [shape: f32[1,256], index: 2, kind: input, shape index: {}]   ;;  %s1646_s3 = inlined_call_operand.hbm [shape: bf16[256,256], index: 3, kind: input, shape index: {}]   ;;  %s1647_s4 = inlined_call_operand.vmem [shape: f32[1,256], index: 4, kind: input, shape index: {}]   ;;  %s1648_s5 = inlined_call_operand.hbm [shape: bf16[256,128], index: 5, kind: input, shape index: {}]   ;;  %s1649_s6 = inlined_call_operand.vmem [shape: f32[1,128], index: 6, kind: input, shape index: {}]   ;;  %s1650_s7 = inlined_call_operand.hbm [shape: f32[16,128], index: 7, kind: output, shape index: {}]  }
   0x1   :  { %1655 = sst [smem:[#allocation15_spill]] %s1644_s1 }
   0x2   :  { %1656 = sst [smem:[#allocation16_spill]] %s1646_s3 }
   0x3   :  { %12 = vsyncpa [#allocation3], 0 }
   0x4   :  { %14 = vsyncpa [#allocation3 + $0x1], 0 }
   0x5   :  { %15 = vsyncpa [#allocation6], 0 }
   0x6   :  { %16 = vsyncpa [#allocation9], 0 }
   0x7   :  { %17 = vsyncpa [#allocation4], 0 }
   0x8   :  { %19 = vsyncpa [#allocation4 + $0x1], 0  ;;  %s1447_s24 = smov 0   ;;  %s1449_s25 = smov 0  }
   0x9   :  { %s1451_s26 = smov 0   ;;  %s1453_s27 = smov 0  }
   0xa LB: > { %s1468_s28 = sadd.s32 4294967295, %s1395_s27   ;;  %s969_s29 = sadd.s32 4294967294, %s1395_s27   ;;  %s1395_s27 = sphi %s1453_s27, %s1678_s27   ;;  %s1391_s26 = sphi %s1451_s26, %s1677_s26   ;;  %s1387_s25 = sphi %s1449_s25, %s1676_s25   ;;  %s1383_s24 = sphi %s1447_s24, %s1675_s24  }
   0xb   : > { %p45_p0 = scmp.ne.s32.totalorder %s1387_s25, %s1383_s24  ;;  %p1651_p1 = scmp.eq.s32.totalorder %s1468_s28, 0 }
   0xc   : > { %p201_p3 = scmp.eq.s32.totalorder %s969_s29, 1  ;;  %p970_p5 = scmp.ge.s32.totalorder %s1395_s27, 1 }
   0xd   : > { %p1477_p4 = por %p1651_p1, %p45_p0  ;;  %p208_p7 = scmp.lt.s32.totalorder %s1395_s27, 3 }
   0xe   : > { %p1482_p6 = por %p201_p3, %p45_p0  ;;  %s1397_s10 = smov [#allocation5]  }
   0xf   : > { %s1657_s30 = scalar_select %p1477_p4, 1, 0 }
  0x10   : > { %s1658_s8 = scalar_select %p1482_p6, 1, 0 }
  0x11   : > { %p1487_p8 = pnand %p970_p5, %p208_p7  ;;  %s220_s11 = sshll.u32 %s1397_s10, 4  ;;  %s221_s11 = int_to_ptr.vmem [resolvable:$true] %s220_s11 }
  0x12   : > { %s1398_s13 = smov [#allocation7]   ;;  %s1399_s15 = smov [#allocation8]  }
  0x13   : > { %s1659_s9 = scalar_select %p1487_p8, 1, 0 }
  0x14   : > { %p1079_p9 = pneg %p1487_p8  ;;  %s236_s14 = sshll.u32 %s1398_s13, 4  ;;  %s237_s14 = int_to_ptr.vmem [resolvable:$true] %s236_s14 }
  0x15   : > { %s252_s16 = sshll.u32 %s1399_s15, 4  ;;  %s1228_s17 = scalar_lea.vmem %s221_s11, 512  ;;  %s253_s16 = int_to_ptr.vmem [resolvable:$true] %s252_s16 }
  0x16   : > { %p1496_p11 = pnand %p1079_p9, %p1651_p1  ;;  %p1229_p13 = scmp.ne.s32.totalorder %s221_s11, %s1228_s17 }
  0x17   : > { %p1236_p5 = scmp.lt.s32.totalorder %s221_s11, %s221_s11  ;;  %p1237_p7 = scmp.lt.s32.totalorder %s1228_s17, %s1228_s17 }
  0x18   : > { %p1219_p12 = pneg %p1496_p11 }
  0x19   : > { %p1238_p9 = por %p1237_p7, %p1236_p5 }
  0x1a   : > { %p1231_p0 = pnand %p1229_p13, %p1219_p12 }
  0x1c   : > { %p1232_p3 = pneg %p1231_p0 }
  0x1e   : > { %p1239_p10 = pnand %p1238_p9, %p1232_p3 }
  0x20   : > { %1242 = shalt.err (!%p1239_p10)
}
  0x21   : > { %s1400_s18 = smov 128   ;;  %s1401_s19 = smov 8  }
  0x22   : > { %s1661_s1 = sld [smem:[#allocation15_spill]]  ;;  %s1254_s22 = scalar_lea.vmem %s237_s14, 4096 }
  0x23   : > { %p1255_p1 = scmp.ne.s32.totalorder %s237_s14, %s1254_s22  ;;  %p1262_p2 = scmp.lt.s32.totalorder %s237_s14, %s237_s14 }
  0x24   : > { %p1263_p6 = scmp.lt.s32.totalorder %s1254_s22, %s1254_s22 }
  0x25   : > { %p1257_p13 = pnand %p1255_p1, %p1219_p12 }
  0x26   : > { %p1264_p5 = por %p1263_p6, %p1262_p2 }
  0x27   : > { %p1258_p0 = pneg %p1257_p13 }
  0x28   : > { %1082 = dma.hbm_to_vmem [thread:$0]  (!%p1496_p11), %s1661_s1, 512, %s221_s11, [#allocation6], %s1400_s18, %s1400_s18, %s1401_s19  }
  0x29   : > { %p1265_p3 = pnand %p1264_p5, %p1258_p0 }
  0x2b   : > { %1268 = shalt.err (!%p1265_p3)
}
  0x2c   : > { %s1662_s3 = sld [smem:[#allocation16_spill]]  ;;  %s1280_s10 = scalar_lea.vmem %s253_s16, 2048 }
  0x2d   : > { %p1281_p10 = scmp.ne.s32.totalorder %s253_s16, %s1280_s10  ;;  %p1288_p9 = scmp.lt.s32.totalorder %s253_s16, %s253_s16 }
  0x2e   : > { %p1289_p13 = scmp.lt.s32.totalorder %s1280_s10, %s1280_s10 }
  0x2f   : > { %p1283_p7 = pnand %p1281_p10, %p1219_p12 }
  0x30   : > { %p1290_p4 = por %p1289_p13, %p1288_p9 }
  0x31   : > { %p1284_p1 = pneg %p1283_p7 }
  0x32   : > { %1085 = dma.hbm_to_vmem [thread:$0]  (!%p1496_p11), %s1662_s3, 4096, %s237_s14, [#allocation6], %s1400_s18, %s1400_s18, %s1401_s19  }
  0x33   : > { %p1291_p2 = pnand %p1290_p4, %p1284_p1 }
  0x35   : > { %1294 = shalt.err (!%p1291_p2)
}
  0x36   : > { %s1402_s11 = smov 64   ;;  %s1403_s13 = smov 4  }
  0x37   : > { %1088 = dma.hbm_to_vmem [thread:$0]  (!%p1496_p11), %s1648_s5, 2048, %s253_s16, [#allocation9], %s1402_s11, %s1402_s11, %s1403_s13  }
  0x38   : > { %s1527_s17 = sadd.s32 1, %s1395_s27   ;;  %s32_s19 = sadd.s32 1, %s1391_s26 }
  0x39   : > { %s29_s18 = ssub.s32 %s1395_s27, %s1527_s17  ;;  %p39_p6 = scmp.ne.s32.totalorder %s1391_s26, %s1387_s25 }
  0x3a   : > { %p30_p4 = scmp.eq.s32.totalorder %s29_s18, 0  ;;  %p40_p12 = scmp.eq.s32.totalorder %s1395_s27, 0 }
  0x3b   : > { %p1100_p0 = scmp.lt.s32.totalorder %s1395_s27, 2  ;;  %p1663_p3 = scmp.eq.s32.totalorder %s1468_s28, 1 }
  0x3c   : > { %s1537_s20 = scalar_select %p30_p4, %s1391_s26, %s32_s19  }
  0x3d   : > { %p41_p5 = por %p40_p12, %p39_p6  ;;  %p1541_p10 = por %p1663_p3, %p39_p6 }
  0x3e   : > { %s269_s12 = sand.u32 1, %s1391_s26   ;;  %s976_s22 = sshll.u32 %s1395_s27, 7 }
  0x3f   : > { %s1664_s21 = scalar_select %p1541_p10, 1, 0 }
  0x40   : > { %s975_s16 = sshll.u32 %s269_s12, 3  ;;  %s1550_s10 = scalar_lea.hbm %s1643_s0, %s976_s22 }
  0x41   : > { %s273_s11 = scalar_lea.vmem [#allocation2], %s975_s16  ;;  %p1552_p11 = pnand %p1100_p0, %p41_p5 }
  0x42   : > { %s280_s13 = sshll.u32 %s273_s11, 4  ;;  %s270_s15 = scalar_lea.sflag [#allocation3], %s269_s12  ;;  %s281_s13 = int_to_ptr.vmem [resolvable:$true] %s280_s13 }
  0x43   : > { %s1295_s18 = scalar_lea.hbm %s1550_s10, 128  ;;  %p1297_p1 = pneg %p1552_p11 }
  0x44   : > { %p1296_p7 = scmp.ne.s32.totalorder %s1550_s10, %s1295_s18  ;;  %s1300_s23 = scalar_lea.hbm %s1643_s0, 256 }
  0x45   : > { %p1301_p2 = scmp.lt.s32.totalorder %s1550_s10, %s1643_s0  ;;  %p1302_p4 = scmp.lt.s32.totalorder %s1300_s23, %s1295_s18 }
  0x46   : > { %p1298_p9 = pnand %p1297_p1, %p1296_p7 }
  0x47   : > { %p1303_p6 = por %p1302_p4, %p1301_p2 }
  0x48   : > { %p1299_p13 = pneg %p1298_p9 }
  0x4a   : > { %p1304_p12 = pnand %p1303_p6, %p1299_p13 }
  0x4c   : > { %1307 = shalt.err (!%p1304_p12)
}
  0x4d   : > { %s1308_s11 = scalar_lea.vmem %s281_s13, 128  ;;  %s1404_s12 = smov [#allocation2]  }
  0x4e   : > { %p1309_p0 = scmp.ne.s32.totalorder %s281_s13, %s1308_s11  ;;  %s1313_s1 = sshll.u32 %s1404_s12, 4  ;;  %s1314_s1 = int_to_ptr.vmem [resolvable:$false] %s1313_s1 }
  0x4f   : > { %s1315_s3 = scalar_lea.vmem %s1314_s1, 256  ;;  %p1316_p7 = scmp.lt.s32.totalorder %s281_s13, %s1314_s1 }
  0x50   : > { %p1311_p5 = pnand %p1309_p0, %p1297_p1  ;;  %p1317_p9 = scmp.lt.s32.totalorder %s1315_s3, %s1308_s11 }
  0x52   : > { %p1312_p3 = pneg %p1311_p5  ;;  %p1318_p10 = por %p1317_p9, %p1316_p7 }
  0x54   : > { %p1319_p8 = pnand %p1318_p10, %p1312_p3 }
  0x56   : > { %1322 = shalt.err (!%p1319_p8)
}
  0x57   : > { %1092 = dma.hbm_to_vmem [thread:$0]  (!%p1552_p11), %s1550_s10, 128, %s281_s13, %s270_s15  }
  0x58   : > { %p1666_p13 = scmp.ne.s32.totalorder %s1659_s9, 0 }
  0x59   : > { %s1573_s18 = sand.u32 (!%p1666_p13), 1, %s1387_s25   ;;  %p1667_p10 = scmp.ne.s32.totalorder (!%p1666_p13), %s1657_s30, 0 }
  0x5a   : > { %289 = sbr.rel (%p1666_p13) target bundleno = 742 (0x2e6), region = 48  ;;  %s978_s19 = sshll.u32 (!%p1666_p13), %s1573_s18, 3 }
  0x5b   : > { %s292_s1 = scalar_lea.sflag (!%p1666_p13), [#allocation3], %s1573_s18  ;;  %s295_s3 = scalar_lea.vmem (!%p1666_p13), [#allocation2], %s978_s19 }
  0x5f   : > { %1366 = dma.done.wait (%p1667_p10), %s292_s1, 128  }
  0x60   : > { %1368 = vsyncadd (%p1667_p10), %s292_s1, 4294967168  ;;  %p1668_p8 = scmp.eq.s32.totalorder %s1468_s28, 0 }
  0x62   : > { %1370 = dma.done.wait (%p1668_p8), [#allocation6], 4608   ;;  %p1669_p11 = pmov %p1668_p8 }
  0x63   : > { %p1670_p1 = pmov %p1668_p8 }
  0x64   : > { %1372 = vsyncadd (%p1669_p11), [#allocation6], 4294962688 }
  0x65   : > { %1374 = dma.done.wait (%p1670_p1), [#allocation9], 2048   ;;  %p1671_p2 = pmov %p1670_p1 }
  0x66   : > { %v1405_v0 = vmov 0   ;;  %v1145_v1 = vld [vmem:[#allocation5 + $0x14] ss:$8 sps:$4 sm:$0xff]   ;;  %v1147_v2 = vld [vmem:[#allocation5 + $0x10] ss:$8 sps:$4 sm:$0xff]   ;;  %vm377_vm0 = vcmask 261120   ;;  %v347_v51 = vlaneseq }
  0x67   : > { %1376 = vsyncadd (%p1671_p2), [#allocation9], 4294965248  ;;  %413 = vmatprep.mubr.bf16.mxu0 %v1405_v0  ;;  %393 = vmatprep.subr.bf16.mxu0 %v1145_v1  ;;  %v1148_v3 = vld [vmem:[#allocation5 + $0x4] ss:$8 sps:$4 sm:$0xff]   ;;  %v1150_v4 = vld [vmem:[#allocation5] ss:$8 sps:$4 sm:$0xff]  }
  0x68   : > { %v339_v5 = vld [vmem:[%s295_s3] sm:$0xff]  ;;  %394 = vmatpush1.bf16.msra.mxu0 %v1147_v2  ;;  %v1154_v8 = vld [vmem:[#allocation7 + $0x64] ss:$8 sps:$4 sm:$0xff]   ;;  %v1156_v10 = vld [vmem:[#allocation7 + $0x60] ss:$8 sps:$4 sm:$0xff]   ;;  %v348_v52 = vshrl.u32 %v347_v51, 7 }
  0x69   : > { %v1151_v6 = vld [vmem:[#allocation7 + $0x74] ss:$8 sps:$4 sm:$0xff]   ;;  %395 = vmatprep.subr.bf16.mxu0 %v1148_v3  ;;  %v1153_v7 = vld [vmem:[#allocation7 + $0x70] ss:$8 sps:$4 sm:$0xff]   ;;  %v340_v9 = vpack.c.bf16 %v339_v5, %v339_v5  ;;  %v1160_v13 = vld [vmem:[#allocation7 + $0x44] ss:$8 sps:$4 sm:$0xff]  }
  0x6a   : > { %630 = vmatprep.subr.bf16.mxu1 %v1151_v6  ;;  %v1157_v11 = vld [vmem:[#allocation7 + $0x54] ss:$8 sps:$4 sm:$0xff]   ;;  %v1159_v12 = vld [vmem:[#allocation7 + $0x50] ss:$8 sps:$4 sm:$0xff]   ;;  %v1162_v14 = vld [vmem:[#allocation7 + $0x40] ss:$8 sps:$4 sm:$0xff]  }
  0x6b   : > { %631 = vmatpush1.bf16.msra.mxu1 %v1153_v7  ;;  %v1163_v15 = vld [vmem:[#allocation7 + $0x34] ss:$8 sps:$4 sm:$0xff]   ;;  %v1165_v16 = vld [vmem:[#allocation7 + $0x30] ss:$8 sps:$4 sm:$0xff]   ;;  %v1166_v17 = vld [vmem:[#allocation7 + $0x24] ss:$8 sps:$4 sm:$0xff]  }
  0x6c   : > { %396 = vmatpush1.bf16.msra.mxu0 %v1150_v4  ;;  %632 = vmatprep.subr.bf16.mxu1 %v1154_v8  ;;  %v1168_v18 = vld [vmem:[#allocation7 + $0x20] ss:$8 sps:$4 sm:$0xff]   ;;  %v1169_v19 = vld [vmem:[#allocation7 + $0x14] ss:$8 sps:$4 sm:$0xff]   ;;  %v1171_v20 = vld [vmem:[#allocation7 + $0x10] ss:$8 sps:$4 sm:$0xff]  }
  0x6d   : > { %v1172_v21 = vld [vmem:[#allocation7 + $0x4] ss:$8 sps:$4 sm:$0xff]   ;;  %v1174_v22 = vld [vmem:[#allocation7] ss:$8 sps:$4 sm:$0xff]   ;;  %v1175_v23 = vld [vmem:[#allocation7 + $0xf4] ss:$8 sps:$4 sm:$0xff]  }
  0x6e   : > { %v1177_v24 = vld [vmem:[#allocation7 + $0xf0] ss:$8 sps:$4 sm:$0xff]   ;;  %v1178_v25 = vld [vmem:[#allocation7 + $0xe4] ss:$8 sps:$4 sm:$0xff]   ;;  %v1180_v26 = vld [vmem:[#allocation7 + $0xe0] ss:$8 sps:$4 sm:$0xff]  }
  0x6f   : > { %987 = vmatmul.mubr.msk.bf16.vlgmr.msra.gmra.mxu0 %vm377_vm0, %v340_v9  ;;  %633 = vmatpush1.bf16.msra.mxu1 %v1156_v10  ;;  %v1181_v27 = vld [vmem:[#allocation7 + $0xd4] ss:$8 sps:$4 sm:$0xff]   ;;  %v1183_v28 = vld [vmem:[#allocation7 + $0xd0] ss:$8 sps:$4 sm:$0xff]   ;;  %v1184_v29 = vld [vmem:[#allocation7 + $0xc4] ss:$8 sps:$4 sm:$0xff]  }
  0x70   : > { %634 = vmatprep.subr.bf16.mxu1 %v1157_v11  ;;  %v1186_v30 = vld [vmem:[#allocation7 + $0xc0] ss:$8 sps:$4 sm:$0xff]   ;;  %v1187_v31 = vld [vmem:[#allocation7 + $0xb4] ss:$8 sps:$4 sm:$0xff]   ;;  %v1189_v32 = vld [vmem:[#allocation7 + $0xb0] ss:$8 sps:$4 sm:$0xff]  }
  0x71   : > { %v1190_v33 = vld [vmem:[#allocation7 + $0xa4] ss:$8 sps:$4 sm:$0xff]   ;;  %v1192_v34 = vld [vmem:[#allocation7 + $0xa0] ss:$8 sps:$4 sm:$0xff]   ;;  %v1193_v35 = vld [vmem:[#allocation7 + $0x94] ss:$8 sps:$4 sm:$0xff]  }
  0x72   : > { %v1195_v36 = vld [vmem:[#allocation7 + $0x90] ss:$8 sps:$4 sm:$0xff]   ;;  %v1196_v37 = vld [vmem:[#allocation7 + $0x84] ss:$8 sps:$4 sm:$0xff]   ;;  %v1198_v38 = vld [vmem:[#allocation7 + $0x80] ss:$8 sps:$4 sm:$0xff]  }
  0x73   : > { %635 = vmatpush1.bf16.msra.mxu1 %v1159_v12  ;;  %v1199_v39 = vld [vmem:[#allocation8 + $0x78] sm:$0xff]   ;;  %v1201_v41 = vld [vmem:[#allocation8 + $0x70] sm:$0xff]   ;;  %v1203_v43 = vld [vmem:[#allocation8 + $0x68] sm:$0xff]   ;;  %v349_v53 = vsub.s32 0, %v348_v52  ;;  %v353_v55 = vsub.s32 1, %v348_v52  ;;  %s1038_s22 = sshll.u32 %s1468_s28, 7 }
  0x74   : > { %636 = vmatprep.subr.bf16.mxu1 %v1160_v13  ;;  %v1200_v40 = vld [vmem:[#allocation8 + $0x38] sm:$0xff]   ;;  %1041 = vmatprep.subr.bf16.mxu0 %v1199_v39  ;;  %v1202_v42 = vld [vmem:[#allocation8 + $0x30] sm:$0xff]   ;;  %v1204_v44 = vld [vmem:[#allocation8 + $0x28] sm:$0xff]   ;;  %s337_s23 = scalar_lea.vmem [#allocation10], %s978_s19  ;;  %s1606_s12 = scalar_lea.hbm %s1650_s7, %s1038_s22 }
  0x75   : > { %1042 = vmatpush3.bf16.msra.mxu0 %v1200_v40  ;;  %v1205_v45 = vld [vmem:[#allocation8 + $0x60] sm:$0xff]   ;;  %v1207_v47 = vld [vmem:[#allocation8 + $0x58] sm:$0xff]   ;;  %v1209_v49 = vld [vmem:[#allocation8 + $0x50] sm:$0xff]   ;;  %s870_s29 = sshll.u32 %s337_s23, 4  ;;  %s857_s1 = scalar_lea.sflag [#allocation4], %s1573_s18  ;;  %s871_s29 = int_to_ptr.vmem [resolvable:$true] %s870_s29 }
  0x76   : > { %1043 = vmatprep.subr.bf16.mxu0 %v1201_v41  ;;  %v1206_v46 = vld [vmem:[#allocation8 + $0x20] sm:$0xff]   ;;  %v1208_v48 = vld [vmem:[#allocation8 + $0x18] sm:$0xff]   ;;  %v1210_v50 = vld [vmem:[#allocation8 + $0x10] sm:$0xff]   ;;  %s1323_s3 = scalar_lea.vmem %s871_s29, 128  ;;  %p1672_p6 = scmp.ne.s32.totalorder %s1664_s21, 0 }
  0x77   : > { %637 = vmatpush1.bf16.msra.mxu1 %v1162_v14  ;;  %v345_v54 = vld [vmem:[%s1645_s2] sm:$0x3]  ;;  %v1211_v4 = vld [vmem:[#allocation8 + $0x48] sm:$0xff]   ;;  %v1213_v6 = vld [vmem:[#allocation8 + $0x40] sm:$0xff]   ;;  %p1324_p4 = scmp.ne.s32.totalorder %s871_s29, %s1323_s3  ;;  %s1406_s28 = smov [#allocation10]  }
  0x78   : > { %638 = vmatprep.subr.bf16.mxu1 %v1163_v15  ;;  %v350_v56 = vrot.slane %v345_v54, %v349_v53  ;;  %v354_v57 = vrot.slane %v345_v54, %v353_v55  ;;  %v1212_v5 = vld [vmem:[#allocation8 + $0x8] sm:$0xff]   ;;  %v1214_v7 = vld [vmem:[#allocation8] sm:$0xff]   ;;  %v458_v8 = vld [vmem:[%s1647_s4] sm:$0x3]  ;;  %s1327_s30 = sshll.u32 %s1406_s28, 4  ;;  %s1328_s30 = int_to_ptr.vmem [resolvable:$false] %s1327_s30 }
  0x79   : > { %1044 = vmatpush3.bf16.msra.mxu0 %v1202_v42  ;;  %v463_v9 = vrot.slane %v458_v8, %v349_v53  ;;  %v467_v10 = vrot.slane %v458_v8, %v353_v55  ;;  %p1325_p12 = pnand %p1324_p4, %p1672_p6  ;;  %s1329_s19 = scalar_lea.vmem %s1328_s30, 256 }
  0x7a   : > { %1045 = vmatprep.subr.bf16.mxu0 %v1203_v43  ;;  %p1330_p5 = scmp.lt.s32.totalorder %s871_s29, %s1328_s30  ;;  %p1331_p3 = scmp.lt.s32.totalorder %s1329_s19, %s1323_s3 }
  0x7b   : > { %639 = vmatpush1.bf16.msra.mxu1 %v1165_v16  ;;  %p1326_p0 = pneg %p1325_p12 }
  0x7c   : > { %640 = vmatprep.subr.bf16.mxu1 %v1166_v17  ;;  %p1332_p7 = por %p1331_p3, %p1330_p5 }
  0x7d   : > { %1046 = vmatpush3.bf16.msra.mxu0 %v1204_v44 }
  0x7e   : > { %1047 = vmatprep.subr.bf16.mxu0 %v1205_v45  ;;  %p1333_p9 = pnand %p1332_p7, %p1326_p0 }
  0x7f   : > { %641 = vmatpush1.bf16.msra.mxu1 %v1168_v18 }
  0x80   : > { %642 = vmatprep.subr.bf16.mxu1 %v1169_v19 }
  0x81   : > { %1048 = vmatpush3.bf16.msra.mxu0 %v1206_v46 }
  0x82   : > { %1049 = vmatprep.subr.bf16.mxu0 %v1207_v47 }
  0x83   : > { %643 = vmatpush1.bf16.msra.mxu1 %v1171_v20 }
  0x84   : > { %644 = vmatprep.subr.bf16.mxu1 %v1172_v21 }
  0x85   : > { %1050 = vmatpush3.bf16.msra.mxu0 %v1208_v48 }
  0x86   : > { %1051 = vmatprep.subr.bf16.mxu0 %v1209_v49 }
  0x87   : > { %645 = vmatpush1.bf16.msra.mxu1 %v1174_v22  ;;  %v1020_v22 = vld [vmem:[%s1649_s6] ss:$0 sm:$0xff] }
  0x88   : > { %646 = vmatprep.subr.bf16.mxu1 %v1175_v23 }
  0x89   : > { %1052 = vmatpush3.bf16.msra.mxu0 %v1210_v50 }
  0x8a   : > { %1053 = vmatprep.subr.bf16.mxu0 %v1211_v4 }
  0x8b   : > { %647 = vmatpush2.bf16.msra.mxu1 %v1177_v24 }
  0x8c   : > { %648 = vmatprep.subr.bf16.mxu1 %v1178_v25 }
  0x8d   : > { %1054 = vmatpush3.bf16.msra.mxu0 %v1212_v5 }
  0x8e   : > { %1055 = vmatprep.subr.bf16.mxu0 %v1213_v6 }
  0x8f   : > { %649 = vmatpush2.bf16.msra.mxu1 %v1180_v26 }
  0x90   : > { %650 = vmatprep.subr.bf16.mxu1 %v1181_v27 }
  0x91   : > { %1056 = vmatpush3.bf16.msra.mxu0 %v1214_v7 }
  0x93   : > { %651 = vmatpush2.bf16.msra.mxu1 %v1183_v28  ;;  %v851_v28 = vand.u32 127, %v347_v51 }
  0x94   : > { %652 = vmatprep.subr.bf16.mxu1 %v1184_v29 }
  0x95   : > { %vm852_vm1 = vcmp.eq.s32.totalorder %v851_v28, 8 }
  0x97   : > { %653 = vmatpush2.bf16.msra.mxu1 %v1186_v30 }
  0x98   : > { %654 = vmatprep.subr.bf16.mxu1 %v1187_v31 }
  0x9b   : > { %655 = vmatpush2.bf16.msra.mxu1 %v1189_v32 }
  0x9c   : > { %656 = vmatprep.subr.bf16.mxu1 %v1190_v33 }
  0x9f   : > { %657 = vmatpush2.bf16.msra.mxu1 %v1192_v34 }
  0xa0   : > { %658 = vmatprep.subr.bf16.mxu1 %v1193_v35 }
  0xa3   : > { %659 = vmatpush2.bf16.msra.mxu1 %v1195_v36 }
  0xa4   : > { %660 = vmatprep.subr.bf16.mxu1 %v1196_v37 }
  0xa7   : > { %661 = vmatpush2.bf16.msra.mxu1 %v1198_v38 }
 0x12f   : > { %v415_v58 = vpop.f32.mrf.mxu0 }
 0x130   : > { %v416_v59 = vadd.f32 %v415_v58, %v350_v56 }
 0x131   : > { %v417_v60 = vpop.f32.mrf.mxu0 }
 0x132   : > { %v418_v61 = vadd.f32 %v417_v60, %v354_v57  ;;  %v422_v62 = vmax.f32 %v416_v59, 0.0 }
 0x133   : > { %v419_v63 = vpop.f32.mrf.mxu0 }
 0x134   : > { %v423_v0 = vmax.f32 %v418_v61, 0.0  ;;  %v424_v3 = vpack.c.bf16 %v422_v62, %v422_v62 }
 0x135   : > { %v420_v1 = vpop.f32.mrf.mxu0 }
 0x136   : > { %v425_v2 = vpack.c.bf16 %v423_v0, %v423_v0 }
 0x138   : > { %662 = vmatprep.mubr.bf16.mxu1 %v425_v2 }
 0x139   : > { %663 = vmatmul.mubr.bf16.vlgmr.msra.gmra.mxu1 %v424_v3 }
 0x1f9   : > { %v664_v11 = vpop.f32.mrf.mxu1 }
 0x1fa   : > { %v665_v12 = vadd.f32 %v664_v11, %v463_v9 }
 0x1fb   : > { %v666_v13 = vpop.f32.mrf.mxu1 }
 0x1fc   : > { %v667_v14 = vadd.f32 %v666_v13, %v467_v10  ;;  %v671_v15 = vmax.f32 %v665_v12, 0.0 }
 0x1fd   : > { %v668_v16 = vpop.f32.mrf.mxu1 }
 0x1fe   : > { %v672_v17 = vmax.f32 %v667_v14, 0.0  ;;  %v673_v20 = vpack.c.bf16 %v671_v15, %v671_v15 }
 0x1ff   : > { %v669_v18 = vpop.f32.mrf.mxu1 }
 0x200   : > { %v674_v19 = vpack.c.bf16 %v672_v17, %v672_v17 }
 0x202   : > { %842 = vmatprep.mubr.bf16.mxu0 %v674_v19 }
 0x203   : > { %843 = vmatmul.mubr.bf16.vlgmr.msra.gmra.mxu0 %v673_v20 }
 0x2c3   : > { %v1057_v21 = vpop.f32.mrf.mxu0 }
 0x2c5   : > { %v1058_v23 = vpop.f32.mrf.mxu0 }
 0x2c6   : > { %v1059_v24 = vadd.f32 %v1058_v23, %v1057_v21 }
 0x2c7   : > { %v1060_v25 = vpop.f32.mrf.mxu0 }
 0x2c8   : > { %v845_v26 = vadd.f32 %v1059_v24, %v1020_v22 }
 0x2c9   : > { %v1061_v27 = vpop.f32.mrf.mxu0 }
 0x2ca   : > { %1215 = vtanh.f32 %v845_v26 }
 0x2d7   : > { %v1216_v29 = vpop.eup %1215 }
 0x2d8   : > { %v854_v30 = vsel %vm852_vm1, %v1216_v29, %v845_v26 }
 0x2d9   : > { %855 = vst [vmem:[%s337_s23] sm:$0xff] %v854_v30 }
 0x2da   : > { %1336 = shalt.err (!%p1333_p9)
}
 0x2db   : > { %s1337_s9 = scalar_lea.hbm %s1606_s12, 128  ;;  %s1341_s13 = scalar_lea.hbm %s1650_s7, 256 }
 0x2dc   : > { %p1338_p13 = scmp.ne.s32.totalorder %s1606_s12, %s1337_s9  ;;  %p1342_p11 = scmp.lt.s32.totalorder %s1606_s12, %s1650_s7 }
 0x2dd   : > { %p1343_p1 = scmp.lt.s32.totalorder %s1341_s13, %s1337_s9 }
 0x2de   : > { %p1339_p10 = pnand %p1338_p13, %p1672_p6 }
 0x2df   : > { %p1344_p2 = por %p1343_p1, %p1342_p11 }
 0x2e0   : > { %p1340_p8 = pneg %p1339_p10 }
 0x2e2   : > { %p1345_p4 = pnand %p1344_p2, %p1340_p8 }
 0x2e4   : > { %1348 = shalt.err (!%p1345_p4)
}
 0x2e5   : > { %1077 = dma.vmem_to_hbm [thread:$0]  (%p1672_p6), %s871_s29, 128, %s1606_s12, %s857_s1  }
 0x2e6 PF: > { %s882_s22 = sand.u32 1, %s1383_s24   ;;  %p1673_p12 = scmp.ne.s32.totalorder %s1658_s8, 0 }
 0x2e7   : > { %p1674_p0 = scmp.ge.s32.totalorder %s1395_s27, 2  ;;  %s883_s23 = scalar_lea.sflag [#allocation4], %s882_s22 }
 0x2e9   : > { %p1094_p5 = pnand %p1674_p0, %p1673_p12 }
 0x2eb   : > { %p1095_p3 = pneg %p1094_p5 }
 0x2ed   : > { %1378 = dma.done.wait (%p1095_p3), %s883_s23, 128  }
 0x2ee   : > { %1380 = vsyncadd (%p1095_p3), %s883_s23, 4294967168  ;;  %p22_p7 = scmp.ge.s32.totalorder %s1527_s17, 4   ;;  %s1675_s24 = smov %s1387_s25 }
 0x2ef   : > { %s1676_s25 = smov %s1391_s26  ;;  %s1677_s26 = smov %s1537_s20 }
 0x2f0   : > { %s1678_s27 = smov %s1527_s17  ;;  %24 = sbr.rel (!%p22_p7) target bundleno = 10 (0xa), region = 105 }
 0x2f5   :  { %888 = vsyncpa [#allocation3], 1 }
 0x2f6   :  { %890 = vsyncpa [#allocation3 + $0x1], 1 }
 0x2f7   :  { %891 = vsyncpa [#allocation6], 1 }
 0x2f8   :  { %892 = vsyncpa [#allocation9], 1 }
 0x2f9   :  { %893 = vsyncpa [#allocation4], 1 }
 0x2fa   :  { %895 = vsyncpa [#allocation4 + $0x1], 1 }

</bundles_post_ra>
